<compile_context>
chip_gen: v5e
topology: v5e:2x2
jax: 0.10.0
libtpu: 0.0.40
codegen_flags: <defaults>
</compile_context>

<pallas_src>
import math

import jax
import jax.numpy as jnp
from jax.experimental import pallas as pl
from jax.experimental.pallas import tpu as pltpu


def _copy_kernel(x_ref, o_ref):
    # Pure data movement: one lane-dense VMEM tile in, same tile out.
    o_ref[...] = x_ref[...]


_LANE_CANDIDATES = (4096, 2048, 1024, 512, 256, 128)


def _choose_layout(total, itemsize):
    """Choose a lane-dense (rows, lanes) factorization of the flat tensor.

    Returns (lanes, rows, pad_elems).  lanes is a multiple of 128; rows is a
    multiple of 8 unless the whole slab is small enough to be one full block.
    """
    # Preferred: factorization with rows a multiple of 8 (no padding needed).
    for lanes in _LANE_CANDIDATES:
        if total % (8 * lanes) == 0:
            return lanes, total // lanes, 0
    # Small, lane-aligned but sublane-ragged: a single full block is allowed
    # (block_shape == full array dims bypasses the (8,128) divisibility rule).
    if total % 128 == 0 and total * itemsize <= 4 * 1024 * 1024:
        return 128, total // 128, 0
    # General fallback: pad up to an (8 x 128) grain.  The pad is an extra
    # copy and is only taken for awkward sizes.
    padded = ((total + 1023) // 1024) * 1024
    return 128, padded // 128, padded - total


def _pick_tile_rows(rows, lanes, itemsize, target_bytes=2 * 1024 * 1024):
    """Largest row-tile that divides `rows` and is ~target_bytes per tile."""
    # Sub-32-bit dtypes pack along sublanes: prefer 16-row (bf16) / 32-row
    # (int8) alignment; 8 rows for 32-bit dtypes.
    row_pack = max(8, 32 // max(itemsize, 1))
    target = max(row_pack, target_bytes // (lanes * itemsize))
    target = min(rows, (target // row_pack) * row_pack)
    for step in (row_pack, 8):
        d = (min(target, rows) // step) * step
        while d >= step:
            if rows % d == 0:
                return d
            d -= step
    return rows


def reshape_forward(x, new_shape):
    """Pallas equivalent of Reshape.forward.

    Args:
      x: array of shape (B, ...) with prod(x.shape[1:]) == prod(new_shape).
      new_shape: target per-example shape (excluding the batch dim).

    Returns:
      array of shape (B, *new_shape), same dtype as x.
    """
    new_shape = tuple(int(i) for i in new_shape)
    b = x.shape[0]
    n = math.prod(x.shape[1:])
    assert n == math.prod(new_shape), (
        f"cannot reshape {x.shape[1:]} (size {n}) into {new_shape}")

    total = b * n
    itemsize = jnp.dtype(x.dtype).itemsize
    lanes, rows, pad = _choose_layout(total, itemsize)

    # Metadata-only flatten (row-major, matches torch.reshape on contiguous x).
    flat = x.reshape(-1)
    if pad:
        flat = jnp.pad(flat, (0, pad))
    slab = flat.reshape(rows, lanes)

    if rows % 8 == 0:
        tile_rows = _pick_tile_rows(rows, lanes, itemsize)
    else:
        tile_rows = rows  # single full block (small slab fallback)
    grid = (rows // tile_rows,)

    out = pl.pallas_call(
        _copy_kernel,
        out_shape=jax.ShapeDtypeStruct((rows, lanes), x.dtype),
        grid=grid,
        in_specs=[pl.BlockSpec((tile_rows, lanes), lambda i: (i, 0))],
        out_specs=pl.BlockSpec((tile_rows, lanes), lambda i: (i, 0)),
        input_output_aliases={0: 0},
        compiler_params=pltpu.CompilerParams(
            dimension_semantics=("parallel",)),
    )(slab)

    out_flat = out.reshape(-1)
    if pad:
        out_flat = out_flat[:total]
    # Metadata-only reshape to the requested per-example shape.
    return out_flat.reshape(b, *new_shape)


if __name__ == "__main__":
    key = jax.random.PRNGKey(0)

    # Example input consistent with an NCHW conv activation: (B, C, H, W).
    x = jax.random.normal(key, (2, 4, 16, 16), dtype=jnp.float32)
    new_shape = [16, 64]  # Reshape(new_shape=[16, 64]): 4*16*16 == 16*64
    ref = x.reshape(x.shape[0], *new_shape)
    out = jax.block_until_ready(reshape_forward(x, new_shape))
    assert out.shape == (2, 16, 64), out.shape
    assert out.dtype == x.dtype
    assert bool(jnp.array_equal(out, ref))

    # bf16 path (sublane-packed dtype).
    xb = x.astype(jnp.bfloat16)
    outb = jax.block_until_ready(reshape_forward(xb, [64, 16]))
    assert outb.shape == (2, 64, 16)
    assert bool(jnp.array_equal(outb, xb.reshape(2, 64, 16)))

    # Awkward (non-128-aligned) size exercising the padded fallback path.
    x2 = jax.random.normal(jax.random.PRNGKey(0), (2, 3, 5, 7),
                           dtype=jnp.float32)
    ref2 = x2.reshape(2, 105)
    out2 = jax.block_until_ready(reshape_forward(x2, [105]))
    assert out2.shape == (2, 105), out2.shape
    assert bool(jnp.array_equal(out2, ref2))

    print("KERNEL_OK")
</pallas_src>

<mosaic_0001>
module attributes {stable_mosaic.version = 11 : i64} {
  func.func @_copy_kernel(%arg0: i32, %arg1: memref<8x256xf32, #tpu.memory_space<vmem>>, %arg2: memref<8x256xf32, #tpu.memory_space<vmem>>) attributes {dimension_semantics = [#tpu.dimension_semantics<parallel>], iteration_bounds = array<i64: 1>, scalar_prefetch = 0 : i64, scratch_operands = 0 : i64, tpu.core_type = #tpu.core_type<tc>, window_params = [{transform_indices = @transform_0, window_bounds = array<i64: 8, 256>}, {transform_indices = @transform_1, window_bounds = array<i64: 8, 256>}]} {
    %c0 = arith.constant 0 : index
    %c0_0 = arith.constant 0 : index
    %0 = vector.load %arg1[%c0, %c0_0] : memref<8x256xf32, #tpu.memory_space<vmem>>, vector<8x256xf32>
    %c0_1 = arith.constant 0 : index
    %c0_2 = arith.constant 0 : index
    %1 = vector.load %arg2[%c0_1, %c0_2] : memref<8x256xf32, #tpu.memory_space<vmem>>, vector<8x256xf32>
    tpu.vector_store %arg2[%c0_1, %c0_2], %0 {strides = array<i32>} : memref<8x256xf32, #tpu.memory_space<vmem>>, vector<8x256xf32>,
    return
  }
  func.func @transform_0(%arg0: i32) -> (i32, i32) {
    %c0_i32 = arith.constant 0 : i32
    %c0_i32_0 = arith.constant 0 : i32
    return %arg0, %c0_i32 : i32, i32
  }
  func.func @transform_1(%arg0: i32) -> (i32, i32) {
    %c0_i32 = arith.constant 0 : i32
    %c0_i32_0 = arith.constant 0 : i32
    return %arg0, %c0_i32 : i32, i32
  }
}

</mosaic_0001>

<bundles_post_ra>
// kernel: tpu_custom_call.1
= control target key start
LH: loop header
LB: loop body
LE: loop exit
PB: predicated region body
PF: predicated region fallthrough
CT: control target
= control target key end

     0   :  { %6 = vsyncpa [#allocation3], 0  ;;  %s116_s0 = inlined_call_operand.hbm [shape: f32[8,256], index: 0, kind: input, shape index: {}, may-alias: {0,1}]   ;;  %s117_s1 = inlined_call_operand.hbm [shape: f32[8,256], index: 1, kind: output, shape index: {}, may-alias: {0,1}]  }
   0x1   :  { %7 = vsyncpa [#allocation4], 0  ;;  %s13_s8 = sshll.u32 %s116_s0, 4  ;;  %s98_s9 = smov [#allocation2]   ;;  %s14_s8 = int_to_ptr.hbm [resolvable:$true] %s13_s8 }
   0x2   :  { %s15_s10 = sshll.u32 %s98_s9, 4  ;;  %s16_s10 = int_to_ptr.vmem [resolvable:$true] %s15_s10 }
   0x3   :  { %18 = dma.hbm_to_vmem [thread:$0]  %s14_s8, 256, %s16_s10, [#allocation3]  }
   0x4   :  { %94 = dma.done.wait [#allocation3], 256  }
   0x5   :  { %95 = vsyncadd [#allocation3], 4294967040  ;;  %s99_s11 = smov [#allocation5]   ;;  %s34_s15 = sshll.u32 %s117_s1, 4  ;;  %v23_v0 = vld [vmem:[#allocation2] sm:$0xff]  ;;  %v24_v1 = vld [vmem:[#allocation2 + $0x8] sm:$0xff]  ;;  %s35_s15 = int_to_ptr.hbm [resolvable:$true] %s34_s15 }
   0x6   :  { %s32_s12 = sshll.u32 %s99_s11, 4  ;;  %25 = vst [vmem:[#allocation5] sm:$0xff] %v23_v0  ;;  %s33_s12 = int_to_ptr.vmem [resolvable:$true] %s32_s12 }
   0x7   :  { %26 = vst [vmem:[#allocation5 + $0x8] sm:$0xff] %v24_v1 }
   0x8   :  { %37 = dma.vmem_to_hbm [thread:$0]  %s33_s12, 256, %s35_s15, [#allocation4]  }
   0x9   :  { %96 = dma.done.wait [#allocation4], 256  }
   0xa   :  { %97 = vsyncadd [#allocation4], 4294967040 }
   0xb   :  { %42 = vsyncpa [#allocation3], 1 }
   0xc   :  { %43 = vsyncpa [#allocation4], 1 }

</bundles_post_ra>
